<compile_context>
chip_gen: v6e
topology: v6e:2x2x1
jax: 0.10.0
libtpu: 0.0.40
codegen_flags: <defaults>
</compile_context>

<pallas_src>
import functools
import math

import jax
import jax.numpy as jnp
from jax import lax
from jax.experimental import pallas as pl
from jax.experimental.pallas import tpu as pltpu


# --------------------------------------------------------------------------
# Small in-kernel helpers
# --------------------------------------------------------------------------
def _softmax_last(s):
    s = s - jnp.max(s, axis=-1, keepdims=True)
    e = jnp.exp(s)
    return e / jnp.sum(e, axis=-1, keepdims=True)


def _dnn(a, b):
    # a (M, K) @ b (K, N) -> (M, N).  Default MXU precision (per perf review:
    # the tiny chain dots do not need multi-pass f32 emulation).
    return lax.dot_general(a, b, (((1,), (0,)), ((), ())),
                           preferred_element_type=jnp.float32)


def _dnt(a, b):
    # a (M, K) @ b (N, K)^T -> (M, N).  MXU-native transposed operand, so no
    # explicit transpose / relayout is ever materialised inside the kernel.
    return lax.dot_general(a, b, (((1,), (1,)), ((), ())),
                           preferred_element_type=jnp.float32)


def _attention_chain(px, w_ref, aux_ref, colb_ref, C, N):
    """px: (1, C) spatial mean of ONE batch element.

    Returns the gate-folded FiLM parameters gamma/beta as (C, 1) COLUMNS,
    ready to broadcast against the lane-dense (C, HW) feature block.
    """
    f32 = jnp.float32
    inv = 1.0 / math.sqrt(C)

    ps = aux_ref[0:N, :].astype(f32)            # (N, C) support prototypes
    bxu = aux_ref[N:N + 1, :].astype(f32)       # (1, C) fc_x_update bias

    wq_t, wk_t, wv_t = w_ref[0], w_ref[1], w_ref[2]        # (C, C) = W^T
    wxu_a, wxu_b = w_ref[3], w_ref[4]                      # fc_x_update split
    wsq_t, wsk_t, wsv_t = w_ref[5], w_ref[6], w_ref[7]     # fc_spt_spt_* W^T
    wg_a, wg_b, wb_a, wb_b = w_ref[8], w_ref[9], w_ref[10], w_ref[11]

    # --- stage 1: x-prototype attends over the support prototypes ----------
    q1 = _dnn(px, wq_t)                          # (1, C)
    k1 = _dnn(ps, wk_t)                          # (N, C)
    v1 = _dnn(ps, wv_t)                          # (N, C)
    p1 = _softmax_last(_dnt(q1, k1) * inv)       # (1, N)
    agg1 = _dnn(p1, v1)                          # (1, C)
    # fc_x_update(cat([px, agg1])) without the lane-axis concatenate
    px2 = _dnn(px, wxu_a) + _dnn(agg1, wxu_b) + bxu        # (1, C)

    # --- stage 2: support-support self-attention with the updated x-proto --
    ps2 = ps + px2                               # (N, C) broadcast add
    q2 = _dnn(ps2, wsq_t)
    k2 = _dnn(ps2, wsk_t)
    v2 = _dnn(ps2, wsv_t)
    p2 = _softmax_last(_dnt(q2, k2) * inv)       # (N, N)
    ps3 = _dnn(p2, v2)                           # (N, C)

    # --- stage 3: updated x-prototype attends over the updated support set -
    q3 = _dnn(px2, wq_t)                         # (1, C)
    k3 = _dnn(ps3, wk_t)
    v3 = _dnn(ps3, wv_t)
    p3 = _softmax_last(_dnt(q3, k3) * inv)       # (1, N)
    agg3 = _dnn(p3, v3)                          # (1, C)

    # --- fc_update with the FiLM gates pre-folded, emitted as columns ------
    # gamma[c] = sum_k wg[c,k] * cat3[k] + bias[c]  -> a @ b^T dot -> (C, 1)
    gamma = _dnt(wg_a, px2) + _dnt(wg_b, agg3) + colb_ref[0].astype(f32)
    beta = _dnt(wb_a, px2) + _dnt(wb_b, agg3) + colb_ref[1].astype(f32)
    return gamma, beta


# --------------------------------------------------------------------------
# Kernel bodies
# --------------------------------------------------------------------------
def _make_fused_kernel(C, N, HW):
    """Fully fused: mean + attention chain + FiLM apply for one batch element."""
    inv_hw = 1.0 / float(HW)

    def kernel(x_ref, w_ref, aux_ref, colb_ref, o_ref):
        f32 = jnp.float32
        x = x_ref[0].astype(f32)                     # (C, HW), lane-dense
        # spatial mean as a (1, C) row computed on the MXU (no relayout)
        ones_hw = jnp.ones((1, HW), f32)
        px = _dnt(ones_hw, x) * inv_hw               # (1, C)
        gamma, beta = _attention_chain(px, w_ref, aux_ref, colb_ref, C, N)
        o_ref[0] = (gamma * x + beta).astype(o_ref.dtype)

    return kernel


def _make_params_kernel(C, N, HW):
    """Fallback pass A: HW-tiled spatial-mean reduction + attention chain."""
    inv_hw = 1.0 / float(HW)

    def kernel(x_ref, w_ref, aux_ref, colb_ref, g_ref, b_ref, acc_ref):
        f32 = jnp.float32
        h = pl.program_id(1)

        @pl.when(h == 0)
        def _():
            acc_ref[...] = jnp.zeros_like(acc_ref)

        xt = x_ref[0].astype(f32)                    # (C, hw_tile)
        ones_t = jnp.ones((1, xt.shape[-1]), f32)
        acc_ref[...] += _dnt(ones_t, xt)             # (1, C) partial sums

        @pl.when(h == pl.num_programs(1) - 1)
        def _():
            px = acc_ref[...] * inv_hw               # (1, C)
            gamma, beta = _attention_chain(px, w_ref, aux_ref, colb_ref, C, N)
            g_ref[0] = gamma.astype(g_ref.dtype)     # (C, 1)
            b_ref[0] = beta.astype(b_ref.dtype)

    return kernel


def _film_apply_kernel(x_ref, g_ref, b_ref, o_ref):
    # x_ref/o_ref: (row_tile, hw_tile); g_ref/b_ref: (row_tile, 1)
    o_ref[...] = (g_ref[...] * x_ref[...].astype(jnp.float32)
                  + b_ref[...]).astype(o_ref.dtype)


# --------------------------------------------------------------------------
# VMEM-aware tile pickers (fallback path only)
# --------------------------------------------------------------------------
def _pick_hw_tile(HW, bytes_per_col, target_bytes):
    """Largest multiple-of-128 divisor of HW whose block stays under target
    (at least 128); full HW when HW is not lane-aligned (blocks must then span
    the whole last dim)."""
    if HW % 128 != 0:
        return HW
    best = 128
    for t in range(128, HW + 1, 128):
        if HW % t == 0 and t * bytes_per_col <= target_bytes:
            best = t
    return best


def _pick_apply_tiles(R, HW, itemsize, target_bytes=1 << 20,
                      budget_bytes=16 << 20):
    """(row_tile, hw_tile) for the collapsed (B*C, HW) FiLM apply: lane-dense,
    ~>=1 MiB per grid step, and <= ~budget for the double-buffered in+out."""
    hw_tile = _pick_hw_tile(HW, 8 * itemsize, budget_bytes // 4)
    if R % 8 != 0:
        row_tile = R
    else:
        row_tile = 8
        for rt in range(8, R + 1, 8):
            if R % rt != 0:
                continue
            if 4 * rt * hw_tile * itemsize > budget_bytes:
                break
            row_tile = rt
            if rt * hw_tile * itemsize >= target_bytes:
                break
    if row_tile == R and hw_tile == HW and R % 16 == 0:
        row_tile = R // 2   # keep >= 2 parallel steps for the v7x megacore
    return row_tile, hw_tile


# --------------------------------------------------------------------------
# Trace-time operand packing (weight slabs, gate folding)
# --------------------------------------------------------------------------
def _prep_operands(proto_spt, params, C):
    f32 = jnp.float32
    gscale = params["gamma_scale_gate"].reshape(C).astype(f32)
    gbias = params["gamma_bias_gate"].reshape(C).astype(f32)
    bscale = params["beta_scale_gate"].reshape(C).astype(f32)
    Wu = params["Wu"].astype(f32)                       # (2C, 2C), out x in
    bu = params["bu"].astype(f32)                       # (2C,)
    wxu_t = params["Wxu"].T.astype(f32)                 # (2C, C)
    wgc = gscale[:, None] * Wu[:C, :]                   # (C, 2C) gate-folded
    wbc = bscale[:, None] * Wu[C:, :]                   # (C, 2C) gate-folded

    wslab = jnp.stack([
        params["Wq"].T.astype(f32), params["Wk"].T.astype(f32),
        params["Wv"].T.astype(f32),
        wxu_t[:C, :], wxu_t[C:, :],
        params["Wssq"].T.astype(f32), params["Wssk"].T.astype(f32),
        params["Wssv"].T.astype(f32),
        wgc[:, :C], wgc[:, C:], wbc[:, :C], wbc[:, C:],
    ], axis=0)                                          # (12, C, C)

    aux = jnp.concatenate(
        [proto_spt.astype(f32), params["bxu"].reshape(1, C).astype(f32)],
        axis=0)                                         # (N+1, C)

    colb = jnp.stack([(bu[:C] * gscale + gbias).reshape(C, 1),
                      (bu[C:] * bscale).reshape(C, 1)], axis=0)   # (2, C, 1)
    return wslab, aux, colb


# --------------------------------------------------------------------------
# Public wrapper
# --------------------------------------------------------------------------
def attention_module_v2(x, proto_spt, params, *, force_fallback=False,
                        donate_x=False):
    """x: (B, C, H, W) NCHW, proto_spt: (N, C). Returns (B, C, H, W)."""
    B, C, H, W = x.shape
    N = proto_spt.shape[0]
    HW = H * W
    f32 = jnp.float32
    itemsize = jnp.dtype(x.dtype).itemsize

    x3 = x.reshape(B, C, HW)            # pure metadata, stays lane-dense
    wslab, aux, colb = _prep_operands(proto_spt, params, C)
    slab_bytes = 2 * 4 * (wslab.size + aux.size + colb.size)
    io_alias = {0: 0} if donate_x else {}

    # ---- primary path: one fused kernel, grid=(B,) ----
    x_block_bytes = C * HW * itemsize
    fused_vmem = 4 * x_block_bytes + 2 * C * HW * 4 + slab_bytes + (1 << 20)
    use_fused = ((not force_fallback) and fused_vmem <= (12 << 20)
                 and (B >= 2 or x_block_bytes <= (128 << 10)))

    if use_fused:
        out3 = pl.pallas_call(
            _make_fused_kernel(C, N, HW),
            out_shape=jax.ShapeDtypeStruct((B, C, HW), x.dtype),
            grid=(B,),
            in_specs=[pl.BlockSpec((1, C, HW), lambda b: (b, 0, 0)),
                      pl.BlockSpec((12, C, C), lambda b: (0, 0, 0)),
                      pl.BlockSpec((N + 1, C), lambda b: (0, 0)),
                      pl.BlockSpec((2, C, 1), lambda b: (0, 0, 0))],
            out_specs=pl.BlockSpec((1, C, HW), lambda b: (b, 0, 0)),
            input_output_aliases=io_alias,
            compiler_params=pltpu.CompilerParams(
                dimension_semantics=("parallel",),
                vmem_limit_bytes=32 * 1024 * 1024),
        )(x3, wslab, aux, colb)
        return out3.reshape(B, C, H, W)

    # ---- fallback for large feature maps: two passes ----
    # pass A: spatial mean (HW-tiled reduction) + attention chain -> (B, C, 1)
    hw_tile_p = _pick_hw_tile(HW, C * itemsize, 2 << 20)
    gamma, beta = pl.pallas_call(
        _make_params_kernel(C, N, HW),
        out_shape=(jax.ShapeDtypeStruct((B, C, 1), f32),
                   jax.ShapeDtypeStruct((B, C, 1), f32)),
        grid=(B, HW // hw_tile_p),
        in_specs=[pl.BlockSpec((1, C, hw_tile_p), lambda b, h: (b, 0, h)),
                  pl.BlockSpec((12, C, C), lambda b, h: (0, 0, 0)),
                  pl.BlockSpec((N + 1, C), lambda b, h: (0, 0)),
                  pl.BlockSpec((2, C, 1), lambda b, h: (0, 0, 0))],
        out_specs=(pl.BlockSpec((1, C, 1), lambda b, h: (b, 0, 0)),
                   pl.BlockSpec((1, C, 1), lambda b, h: (b, 0, 0))),
        scratch_shapes=[pltpu.VMEM((1, C), f32)],
        compiler_params=pltpu.CompilerParams(
            dimension_semantics=("parallel", "arbitrary"),
            vmem_limit_bytes=32 * 1024 * 1024),
    )(x3, wslab, aux, colb)

    # pass B: big-block, lane-dense FiLM apply on the collapsed (B*C, HW) view
    R = B * C
    x2 = x3.reshape(R, HW)
    g2 = gamma.reshape(R, 1)
    b2 = beta.reshape(R, 1)
    row_tile, hw_tile = _pick_apply_tiles(R, HW, itemsize)
    out2 = pl.pallas_call(
        _film_apply_kernel,
        out_shape=jax.ShapeDtypeStruct((R, HW), x.dtype),
        grid=(R // row_tile, HW // hw_tile),
        in_specs=[pl.BlockSpec((row_tile, hw_tile), lambda r, h: (r, h)),
                  pl.BlockSpec((row_tile, 1), lambda r, h: (r, 0)),
                  pl.BlockSpec((row_tile, 1), lambda r, h: (r, 0))],
        out_specs=pl.BlockSpec((row_tile, hw_tile), lambda r, h: (r, h)),
        input_output_aliases=io_alias,
        compiler_params=pltpu.CompilerParams(
            dimension_semantics=("parallel", "parallel"),
            vmem_limit_bytes=32 * 1024 * 1024),
    )(x2, g2, b2)
    return out2.reshape(B, C, H, W)


# --------------------------------------------------------------------------
# Pure-JAX reference (mirror of the PyTorch forward), f32-exact precision
# --------------------------------------------------------------------------
def reference_forward(x, proto_spt, params):
    B, C, H, W = x.shape
    inv = 1.0 / math.sqrt(C)
    mm = functools.partial(jnp.matmul, precision=jax.lax.Precision.HIGHEST)
    lin = lambda z, W_: mm(z, W_.T)

    proto_x = x.mean(axis=3).mean(axis=2)[:, None, :]        # (B,1,C)
    ps = proto_spt[None]                                     # (1,N,C)

    q = lin(proto_x, params["Wq"]); k = lin(ps, params["Wk"]); v = lin(ps, params["Wv"])
    corr = jax.nn.softmax(mm(q, jnp.swapaxes(k, 1, 2)) * inv, axis=-1)
    agg = mm(corr, v)
    proto_x = mm(jnp.concatenate([proto_x, agg], -1), params["Wxu"].T) + params["bxu"]

    ps = ps + proto_x
    q = lin(ps, params["Wssq"]); k = lin(ps, params["Wssk"]); v = lin(ps, params["Wssv"])
    corr = jax.nn.softmax(mm(q, jnp.swapaxes(k, 1, 2)) * inv, axis=-1)
    ps = mm(corr, v)

    q = lin(proto_x, params["Wq"]); k = lin(ps, params["Wk"]); v = lin(ps, params["Wv"])
    corr = jax.nn.softmax(mm(q, jnp.swapaxes(k, 1, 2)) * inv, axis=-1)
    agg = mm(corr, v)
    film = mm(jnp.concatenate([proto_x, agg], -1), params["Wu"].T) + params["bu"]

    gamma = film[:, 0, :C][:, :, None, None]
    beta = film[:, 0, C:][:, :, None, None]
    gamma = gamma * params["gamma_scale_gate"].reshape(1, C, 1, 1) \
        + params["gamma_bias_gate"].reshape(1, C, 1, 1)
    beta = beta * params["beta_scale_gate"].reshape(1, C, 1, 1)
    return gamma * x + beta


if __name__ == "__main__":
    B, C, H, W, N = 2, 32, 16, 16, 8   # hidden_size = C = 32, 8 support prototypes
    key = jax.random.PRNGKey(0)
    ks = jax.random.split(key, 16)

    x = jax.random.normal(ks[0], (B, C, H, W), jnp.float32)
    proto_spt = jax.random.normal(ks[1], (N, C), jnp.float32)

    s = 1.0 / math.sqrt(C)
    params = {
        "Wq":   jax.random.normal(ks[2], (C, C), jnp.float32) * s,
        "Wk":   jax.random.normal(ks[3], (C, C), jnp.float32) * s,
        "Wv":   jax.random.normal(ks[4], (C, C), jnp.float32) * s,
        "Wxu":  jax.random.normal(ks[5], (C, 2 * C), jnp.float32) * s,
        "bxu":  jax.random.normal(ks[6], (C,), jnp.float32) * 0.1,
        "Wu":   jax.random.normal(ks[7], (2 * C, 2 * C), jnp.float32) * s,
        "bu":   jax.random.normal(ks[8], (2 * C,), jnp.float32) * 0.1,
        "Wssq": jax.random.normal(ks[9], (C, C), jnp.float32) * s,
        "Wssk": jax.random.normal(ks[10], (C, C), jnp.float32) * s,
        "Wssv": jax.random.normal(ks[11], (C, C), jnp.float32) * s,
        # Module defaults are zeros/ones (output trivially == x); randomized so
        # the FiLM path is actually exercised.
        "gamma_scale_gate": jax.random.normal(ks[12], (C,), jnp.float32) * 0.1,
        "gamma_bias_gate":  1.0 + jax.random.normal(ks[13], (C,), jnp.float32) * 0.1,
        "beta_scale_gate":  jax.random.normal(ks[14], (C,), jnp.float32) * 0.1,
    }

    ref = jax.block_until_ready(reference_forward(x, proto_spt, params))

    # primary fully-fused path
    out = jax.block_until_ready(jax.jit(attention_module_v2)(x, proto_spt, params))
    assert out.shape == (B, C, H, W)
    err = float(jnp.max(jnp.abs(out - ref)))
    assert jnp.allclose(out, ref, rtol=3e-3, atol=3e-3), \
        f"fused path max abs err {err}"

    # also exercise the large-feature-map fallback (tiled mean/params + big-block apply)
    out_fb = jax.block_until_ready(
        jax.jit(functools.partial(attention_module_v2, force_fallback=True))(
            x, proto_spt, params))
    err_fb = float(jnp.max(jnp.abs(out_fb - ref)))
    assert jnp.allclose(out_fb, ref, rtol=3e-3, atol=3e-3), \
        f"fallback path max abs err {err_fb}"

    print("KERNEL_OK")
</pallas_src>

<mosaic_0001>
module attributes {stable_mosaic.version = 11 : i64} {
  func.func @kernel(%arg0: i32, %arg1: memref<1x32x256xf32, #tpu.memory_space<vmem>>, %arg2: memref<12x32x32xf32, #tpu.memory_space<vmem>>, %arg3: memref<9x32xf32, #tpu.memory_space<vmem>>, %arg4: memref<2x32x1xf32, #tpu.memory_space<vmem>>, %arg5: memref<1x32x256xf32, #tpu.memory_space<vmem>>) attributes {dimension_semantics = [#tpu.dimension_semantics<parallel>], iteration_bounds = array<i64: 2>, scalar_prefetch = 0 : i64, scratch_operands = 0 : i64, tpu.core_type = #tpu.core_type<tc>, window_params = [{transform_indices = @transform_0, window_bounds = array<i64: 1, 32, 256>}, {pipeline_mode = #tpu.pipeline_mode<synchronous>, transform_indices = @transform_1, window_bounds = array<i64: 12, 32, 32>}, {pipeline_mode = #tpu.pipeline_mode<synchronous>, transform_indices = @transform_2, window_bounds = array<i64: 9, 32>}, {pipeline_mode = #tpu.pipeline_mode<synchronous>, transform_indices = @transform_3, window_bounds = array<i64: 2, 32, 1>}, {transform_indices = @transform_4, window_bounds = array<i64: 1, 32, 256>}]} {
    %c0 = arith.constant 0 : index
    %c0_0 = arith.constant 0 : index
    %c0_1 = arith.constant 0 : index
    %0 = vector.load %arg1[%c0, %c0_0, %c0_1] : memref<1x32x256xf32, #tpu.memory_space<vmem>>, vector<1x32x256xf32>
    %1 = vector.shape_cast %0 : vector<1x32x256xf32> to vector<32x256xf32>
    %cst = arith.constant 1.000000e+00 : f32
    %2 = vector.broadcast %cst : f32 to vector<1x256xf32>
    %cst_2 = arith.constant dense<0.000000e+00> : vector<1x32xf32>
    %3 = tpu.matmul %2, %1, %cst_2 {dimension_numbers = #tpu.dot_dimension_numbers<[1], [1], [0], [0], [0, 0, 1, 0], [], []>} : vector<1x256xf32>, vector<32x256xf32>, vector<1x32xf32> -> vector<1x32xf32>
    %cst_3 = arith.constant 3.906250e-03 : f32
    %4 = vector.broadcast %cst_3 : f32 to vector<1x32xf32>
    %5 = arith.mulf %3, %4 : vector<1x32xf32>
    %c0_4 = arith.constant 0 : index
    %c0_5 = arith.constant 0 : index
    %6 = vector.load %arg3[%c0_4, %c0_5] : memref<9x32xf32, #tpu.memory_space<vmem>>, vector<8x32xf32>
    %c8 = arith.constant 8 : index
    %c0_6 = arith.constant 0 : index
    %7 = vector.load %arg3[%c8, %c0_6] : memref<9x32xf32, #tpu.memory_space<vmem>>, vector<1x32xf32>
    %c0_7 = arith.constant 0 : index
    %c0_8 = arith.constant 0 : index
    %c0_9 = arith.constant 0 : index
    %8 = vector.load %arg2[%c0_7, %c0_8, %c0_9] : memref<12x32x32xf32, #tpu.memory_space<vmem>>, vector<1x32x32xf32>
    %9 = vector.shape_cast %8 : vector<1x32x32xf32> to vector<32x32xf32>
    %c1 = arith.constant 1 : index
    %c0_10 = arith.constant 0 : index
    %c0_11 = arith.constant 0 : index
    %10 = vector.load %arg2[%c1, %c0_10, %c0_11] : memref<12x32x32xf32, #tpu.memory_space<vmem>>, vector<1x32x32xf32>
    %11 = vector.shape_cast %10 : vector<1x32x32xf32> to vector<32x32xf32>
    %c2 = arith.constant 2 : index
    %c0_12 = arith.constant 0 : index
    %c0_13 = arith.constant 0 : index
    %12 = vector.load %arg2[%c2, %c0_12, %c0_13] : memref<12x32x32xf32, #tpu.memory_space<vmem>>, vector<1x32x32xf32>
    %13 = vector.shape_cast %12 : vector<1x32x32xf32> to vector<32x32xf32>
    %c3 = arith.constant 3 : index
    %c0_14 = arith.constant 0 : index
    %c0_15 = arith.constant 0 : index
    %14 = vector.load %arg2[%c3, %c0_14, %c0_15] : memref<12x32x32xf32, #tpu.memory_space<vmem>>, vector<1x32x32xf32>
    %15 = vector.shape_cast %14 : vector<1x32x32xf32> to vector<32x32xf32>
    %c4 = arith.constant 4 : index
    %c0_16 = arith.constant 0 : index
    %c0_17 = arith.constant 0 : index
    %16 = vector.load %arg2[%c4, %c0_16, %c0_17] : memref<12x32x32xf32, #tpu.memory_space<vmem>>, vector<1x32x32xf32>
    %17 = vector.shape_cast %16 : vector<1x32x32xf32> to vector<32x32xf32>
    %c5 = arith.constant 5 : index
    %c0_18 = arith.constant 0 : index
    %c0_19 = arith.constant 0 : index
    %18 = vector.load %arg2[%c5, %c0_18, %c0_19] : memref<12x32x32xf32, #tpu.memory_space<vmem>>, vector<1x32x32xf32>
    %19 = vector.shape_cast %18 : vector<1x32x32xf32> to vector<32x32xf32>
    %c6 = arith.constant 6 : index
    %c0_20 = arith.constant 0 : index
    %c0_21 = arith.constant 0 : index
    %20 = vector.load %arg2[%c6, %c0_20, %c0_21] : memref<12x32x32xf32, #tpu.memory_space<vmem>>, vector<1x32x32xf32>
    %21 = vector.shape_cast %20 : vector<1x32x32xf32> to vector<32x32xf32>
    %c7 = arith.constant 7 : index
    %c0_22 = arith.constant 0 : index
    %c0_23 = arith.constant 0 : index
    %22 = vector.load %arg2[%c7, %c0_22, %c0_23] : memref<12x32x32xf32, #tpu.memory_space<vmem>>, vector<1x32x32xf32>
    %23 = vector.shape_cast %22 : vector<1x32x32xf32> to vector<32x32xf32>
    %c8_24 = arith.constant 8 : index
    %c0_25 = arith.constant 0 : index
    %c0_26 = arith.constant 0 : index
    %24 = vector.load %arg2[%c8_24, %c0_25, %c0_26] : memref<12x32x32xf32, #tpu.memory_space<vmem>>, vector<1x32x32xf32>
    %25 = vector.shape_cast %24 : vector<1x32x32xf32> to vector<32x32xf32>
    %c9 = arith.constant 9 : index
    %c0_27 = arith.constant 0 : index
    %c0_28 = arith.constant 0 : index
    %26 = vector.load %arg2[%c9, %c0_27, %c0_28] : memref<12x32x32xf32, #tpu.memory_space<vmem>>, vector<1x32x32xf32>
    %27 = vector.shape_cast %26 : vector<1x32x32xf32> to vector<32x32xf32>
    %c10 = arith.constant 10 : index
    %c0_29 = arith.constant 0 : index
    %c0_30 = arith.constant 0 : index
    %28 = vector.load %arg2[%c10, %c0_29, %c0_30] : memref<12x32x32xf32, #tpu.memory_space<vmem>>, vector<1x32x32xf32>
    %29 = vector.shape_cast %28 : vector<1x32x32xf32> to vector<32x32xf32>
    %c11 = arith.constant 11 : index
    %c0_31 = arith.constant 0 : index
    %c0_32 = arith.constant 0 : index
    %30 = vector.load %arg2[%c11, %c0_31, %c0_32] : memref<12x32x32xf32, #tpu.memory_space<vmem>>, vector<1x32x32xf32>
    %31 = vector.shape_cast %30 : vector<1x32x32xf32> to vector<32x32xf32>
    %cst_33 = arith.constant dense<0.000000e+00> : vector<1x32xf32>
    %32 = tpu.matmul %5, %9, %cst_33 {dimension_numbers = #tpu.dot_dimension_numbers<[1], [0], [0], [1], [0, 0, 1, 1], [], []>} : vector<1x32xf32>, vector<32x32xf32>, vector<1x32xf32> -> vector<1x32xf32>
    %cst_34 = arith.constant dense<0.000000e+00> : vector<8x32xf32>
    %33 = tpu.matmul %6, %11, %cst_34 {dimension_numbers = #tpu.dot_dimension_numbers<[1], [0], [0], [1], [0, 0, 1, 1], [], []>} : vector<8x32xf32>, vector<32x32xf32>, vector<8x32xf32> -> vector<8x32xf32>
    %cst_35 = arith.constant dense<0.000000e+00> : vector<8x32xf32>
    %34 = tpu.matmul %6, %13, %cst_35 {dimension_numbers = #tpu.dot_dimension_numbers<[1], [0], [0], [1], [0, 0, 1, 1], [], []>} : vector<8x32xf32>, vector<32x32xf32>, vector<8x32xf32> -> vector<8x32xf32>
    %cst_36 = arith.constant dense<0.000000e+00> : vector<1x8xf32>
    %35 = tpu.matmul %32, %33, %cst_36 {dimension_numbers = #tpu.dot_dimension_numbers<[1], [1], [0], [0], [0, 0, 1, 0], [], []>} : vector<1x32xf32>, vector<8x32xf32>, vector<1x8xf32> -> vector<1x8xf32>
    %cst_37 = arith.constant 0.176776692 : f32
    %36 = vector.broadcast %cst_37 : f32 to vector<1x8xf32>
    %37 = arith.mulf %35, %36 : vector<1x8xf32>
    %cst_38 = arith.constant dense<0xFF800000> : vector<1xf32>
    %38 = vector.multi_reduction <maximumf>, %37, %cst_38 [1] : vector<1x8xf32> to vector<1xf32>
    %39 = vector.shape_cast %38 : vector<1xf32> to vector<1x1xf32>
    %40 = vector.broadcast %39 : vector<1x1xf32> to vector<1x8xf32>
    %41 = arith.subf %37, %40 : vector<1x8xf32>
    %42 = math.exp %41 : vector<1x8xf32>
    %cst_39 = arith.constant dense<0.000000e+00> : vector<1xf32>
    %43 = vector.multi_reduction <add>, %42, %cst_39 [1] : vector<1x8xf32> to vector<1xf32>
    %44 = vector.shape_cast %43 : vector<1xf32> to vector<1x1xf32>
    %45 = vector.broadcast %44 : vector<1x1xf32> to vector<1x8xf32>
    %46 = arith.divf %42, %45 : vector<1x8xf32>
    %cst_40 = arith.constant dense<0.000000e+00> : vector<1x32xf32>
    %47 = tpu.matmul %46, %34, %cst_40 {dimension_numbers = #tpu.dot_dimension_numbers<[1], [0], [0], [1], [0, 0, 1, 1], [], []>} : vector<1x8xf32>, vector<8x32xf32>, vector<1x32xf32> -> vector<1x32xf32>
    %cst_41 = arith.constant dense<0.000000e+00> : vector<1x32xf32>
    %48 = tpu.matmul %5, %15, %cst_41 {dimension_numbers = #tpu.dot_dimension_numbers<[1], [0], [0], [1], [0, 0, 1, 1], [], []>} : vector<1x32xf32>, vector<32x32xf32>, vector<1x32xf32> -> vector<1x32xf32>
    %cst_42 = arith.constant dense<0.000000e+00> : vector<1x32xf32>
    %49 = tpu.matmul %47, %17, %cst_42 {dimension_numbers = #tpu.dot_dimension_numbers<[1], [0], [0], [1], [0, 0, 1, 1], [], []>} : vector<1x32xf32>, vector<32x32xf32>, vector<1x32xf32> -> vector<1x32xf32>
    %50 = arith.addf %48, %49 : vector<1x32xf32>
    %51 = arith.addf %50, %7 : vector<1x32xf32>
    %52 = vector.broadcast %51 : vector<1x32xf32> to vector<8x32xf32>
    %53 = arith.addf %6, %52 : vector<8x32xf32>
    %cst_43 = arith.constant dense<0.000000e+00> : vector<8x32xf32>
    %54 = tpu.matmul %53, %19, %cst_43 {dimension_numbers = #tpu.dot_dimension_numbers<[1], [0], [0], [1], [0, 0, 1, 1], [], []>} : vector<8x32xf32>, vector<32x32xf32>, vector<8x32xf32> -> vector<8x32xf32>
    %cst_44 = arith.constant dense<0.000000e+00> : vector<8x32xf32>
    %55 = tpu.matmul %53, %21, %cst_44 {dimension_numbers = #tpu.dot_dimension_numbers<[1], [0], [0], [1], [0, 0, 1, 1], [], []>} : vector<8x32xf32>, vector<32x32xf32>, vector<8x32xf32> -> vector<8x32xf32>
    %cst_45 = arith.constant dense<0.000000e+00> : vector<8x32xf32>
    %56 = tpu.matmul %53, %23, %cst_45 {dimension_numbers = #tpu.dot_dimension_numbers<[1], [0], [0], [1], [0, 0, 1, 1], [], []>} : vector<8x32xf32>, vector<32x32xf32>, vector<8x32xf32> -> vector<8x32xf32>
    %cst_46 = arith.constant dense<0.000000e+00> : vector<8x8xf32>
    %57 = tpu.matmul %54, %55, %cst_46 {dimension_numbers = #tpu.dot_dimension_numbers<[1], [1], [0], [0], [0, 0, 1, 0], [], []>} : vector<8x32xf32>, vector<8x32xf32>, vector<8x8xf32> -> vector<8x8xf32>
    %cst_47 = arith.constant 0.176776692 : f32
    %58 = vector.broadcast %cst_47 : f32 to vector<8x8xf32>
    %59 = arith.mulf %57, %58 : vector<8x8xf32>
    %cst_48 = arith.constant dense<0xFF800000> : vector<8xf32>
    %60 = vector.multi_reduction <maximumf>, %59, %cst_48 [1] : vector<8x8xf32> to vector<8xf32>
    %61 = vector.shape_cast %60 : vector<8xf32> to vector<8x1xf32>
    %62 = vector.broadcast %61 : vector<8x1xf32> to vector<8x8xf32>
    %63 = arith.subf %59, %62 : vector<8x8xf32>
    %64 = math.exp %63 : vector<8x8xf32>
    %cst_49 = arith.constant dense<0.000000e+00> : vector<8xf32>
    %65 = vector.multi_reduction <add>, %64, %cst_49 [1] : vector<8x8xf32> to vector<8xf32>
    %66 = vector.shape_cast %65 : vector<8xf32> to vector<8x1xf32>
    %67 = vector.broadcast %66 : vector<8x1xf32> to vector<8x8xf32>
    %68 = arith.divf %64, %67 : vector<8x8xf32>
    %cst_50 = arith.constant dense<0.000000e+00> : vector<8x32xf32>
    %69 = tpu.matmul %68, %56, %cst_50 {dimension_numbers = #tpu.dot_dimension_numbers<[1], [0], [0], [1], [0, 0, 1, 1], [], []>} : vector<8x8xf32>, vector<8x32xf32>, vector<8x32xf32> -> vector<8x32xf32>
    %cst_51 = arith.constant dense<0.000000e+00> : vector<1x32xf32>
    %70 = tpu.matmul %51, %9, %cst_51 {dimension_numbers = #tpu.dot_dimension_numbers<[1], [0], [0], [1], [0, 0, 1, 1], [], []>} : vector<1x32xf32>, vector<32x32xf32>, vector<1x32xf32> -> vector<1x32xf32>
    %cst_52 = arith.constant dense<0.000000e+00> : vector<8x32xf32>
    %71 = tpu.matmul %69, %11, %cst_52 {dimension_numbers = #tpu.dot_dimension_numbers<[1], [0], [0], [1], [0, 0, 1, 1], [], []>} : vector<8x32xf32>, vector<32x32xf32>, vector<8x32xf32> -> vector<8x32xf32>
    %cst_53 = arith.constant dense<0.000000e+00> : vector<8x32xf32>
    %72 = tpu.matmul %69, %13, %cst_53 {dimension_numbers = #tpu.dot_dimension_numbers<[1], [0], [0], [1], [0, 0, 1, 1], [], []>} : vector<8x32xf32>, vector<32x32xf32>, vector<8x32xf32> -> vector<8x32xf32>
    %cst_54 = arith.constant dense<0.000000e+00> : vector<1x8xf32>
    %73 = tpu.matmul %70, %71, %cst_54 {dimension_numbers = #tpu.dot_dimension_numbers<[1], [1], [0], [0], [0, 0, 1, 0], [], []>} : vector<1x32xf32>, vector<8x32xf32>, vector<1x8xf32> -> vector<1x8xf32>
    %cst_55 = arith.constant 0.176776692 : f32
    %74 = vector.broadcast %cst_55 : f32 to vector<1x8xf32>
    %75 = arith.mulf %73, %74 : vector<1x8xf32>
    %cst_56 = arith.constant dense<0xFF800000> : vector<1xf32>
    %76 = vector.multi_reduction <maximumf>, %75, %cst_56 [1] : vector<1x8xf32> to vector<1xf32>
    %77 = vector.shape_cast %76 : vector<1xf32> to vector<1x1xf32>
    %78 = vector.broadcast %77 : vector<1x1xf32> to vector<1x8xf32>
    %79 = arith.subf %75, %78 : vector<1x8xf32>
    %80 = math.exp %79 : vector<1x8xf32>
    %cst_57 = arith.constant dense<0.000000e+00> : vector<1xf32>
    %81 = vector.multi_reduction <add>, %80, %cst_57 [1] : vector<1x8xf32> to vector<1xf32>
    %82 = vector.shape_cast %81 : vector<1xf32> to vector<1x1xf32>
    %83 = vector.broadcast %82 : vector<1x1xf32> to vector<1x8xf32>
    %84 = arith.divf %80, %83 : vector<1x8xf32>
    %cst_58 = arith.constant dense<0.000000e+00> : vector<1x32xf32>
    %85 = tpu.matmul %84, %72, %cst_58 {dimension_numbers = #tpu.dot_dimension_numbers<[1], [0], [0], [1], [0, 0, 1, 1], [], []>} : vector<1x8xf32>, vector<8x32xf32>, vector<1x32xf32> -> vector<1x32xf32>
    %cst_59 = arith.constant dense<0.000000e+00> : vector<32x1xf32>
    %86 = tpu.matmul %25, %51, %cst_59 {dimension_numbers = #tpu.dot_dimension_numbers<[1], [1], [0], [0], [0, 0, 1, 0], [], []>} : vector<32x32xf32>, vector<1x32xf32>, vector<32x1xf32> -> vector<32x1xf32>
    %cst_60 = arith.constant dense<0.000000e+00> : vector<32x1xf32>
    %87 = tpu.matmul %27, %85, %cst_60 {dimension_numbers = #tpu.dot_dimension_numbers<[1], [1], [0], [0], [0, 0, 1, 0], [], []>} : vector<32x32xf32>, vector<1x32xf32>, vector<32x1xf32> -> vector<32x1xf32>
    %88 = arith.addf %86, %87 : vector<32x1xf32>
    %c0_61 = arith.constant 0 : index
    %c0_62 = arith.constant 0 : index
    %c0_63 = arith.constant 0 : index
    %89 = vector.load %arg4[%c0_61, %c0_62, %c0_63] : memref<2x32x1xf32, #tpu.memory_space<vmem>>, vector<1x32x1xf32>
    %90 = vector.shape_cast %89 : vector<1x32x1xf32> to vector<32x1xf32>
    %91 = arith.addf %88, %90 : vector<32x1xf32>
    %cst_64 = arith.constant dense<0.000000e+00> : vector<32x1xf32>
    %92 = tpu.matmul %29, %51, %cst_64 {dimension_numbers = #tpu.dot_dimension_numbers<[1], [1], [0], [0], [0, 0, 1, 0], [], []>} : vector<32x32xf32>, vector<1x32xf32>, vector<32x1xf32> -> vector<32x1xf32>
    %cst_65 = arith.constant dense<0.000000e+00> : vector<32x1xf32>
    %93 = tpu.matmul %31, %85, %cst_65 {dimension_numbers = #tpu.dot_dimension_numbers<[1], [1], [0], [0], [0, 0, 1, 0], [], []>} : vector<32x32xf32>, vector<1x32xf32>, vector<32x1xf32> -> vector<32x1xf32>
    %94 = arith.addf %92, %93 : vector<32x1xf32>
    %c1_66 = arith.constant 1 : index
    %c0_67 = arith.constant 0 : index
    %c0_68 = arith.constant 0 : index
    %95 = vector.load %arg4[%c1_66, %c0_67, %c0_68] : memref<2x32x1xf32, #tpu.memory_space<vmem>>, vector<1x32x1xf32>
    %96 = vector.shape_cast %95 : vector<1x32x1xf32> to vector<32x1xf32>
    %97 = arith.addf %94, %96 : vector<32x1xf32>
    %98 = vector.broadcast %91 : vector<32x1xf32> to vector<32x256xf32>
    %99 = arith.mulf %98, %1 : vector<32x256xf32>
    %100 = vector.broadcast %97 : vector<32x1xf32> to vector<32x256xf32>
    %101 = arith.addf %99, %100 : vector<32x256xf32>
    %c0_69 = arith.constant 0 : index
    %c0_70 = arith.constant 0 : index
    %c0_71 = arith.constant 0 : index
    %102 = vector.load %arg5[%c0_69, %c0_70, %c0_71] : memref<1x32x256xf32, #tpu.memory_space<vmem>>, vector<1x32x256xf32>
    %103 = vector.shape_cast %102 : vector<1x32x256xf32> to vector<32x256xf32>
    %104 = vector.shape_cast %101 : vector<32x256xf32> to vector<1x32x256xf32>
    tpu.vector_store %arg5[%c0_69, %c0_70, %c0_71], %104 {strides = array<i32>} : memref<1x32x256xf32, #tpu.memory_space<vmem>>, vector<1x32x256xf32>,
    return
  }
  func.func @transform_0(%arg0: i32) -> (i32, i32, i32) {
    %c0_i32 = arith.constant 0 : i32
    %c0_i32_0 = arith.constant 0 : i32
    %c0_i32_1 = arith.constant 0 : i32
    return %arg0, %c0_i32, %c0_i32_0 : i32, i32, i32
  }
  func.func @transform_1(%arg0: i32) -> (i32, i32, i32) {
    %c0_i32 = arith.constant 0 : i32
    %c0_i32_0 = arith.constant 0 : i32
    %c0_i32_1 = arith.constant 0 : i32
    %c0_i32_2 = arith.constant 0 : i32
    return %c0_i32, %c0_i32_0, %c0_i32_1 : i32, i32, i32
  }
  func.func @transform_2(%arg0: i32) -> (i32, i32) {
    %c0_i32 = arith.constant 0 : i32
    %c0_i32_0 = arith.constant 0 : i32
    %c0_i32_1 = arith.constant 0 : i32
    return %c0_i32, %c0_i32_0 : i32, i32
  }
  func.func @transform_3(%arg0: i32) -> (i32, i32, i32) {
    %c0_i32 = arith.constant 0 : i32
    %c0_i32_0 = arith.constant 0 : i32
    %c0_i32_1 = arith.constant 0 : i32
    %c0_i32_2 = arith.constant 0 : i32
    return %c0_i32, %c0_i32_0, %c0_i32_1 : i32, i32, i32
  }
  func.func @transform_4(%arg0: i32) -> (i32, i32, i32) {
    %c0_i32 = arith.constant 0 : i32
    %c0_i32_0 = arith.constant 0 : i32
    %c0_i32_1 = arith.constant 0 : i32
    return %arg0, %c0_i32, %c0_i32_0 : i32, i32, i32
  }
}

</mosaic_0001>

<bundles_post_ra>
// kernel: attention_module_v2.1
= control target key start
LH: loop header
LB: loop body
LE: loop exit
PB: predicated region body
PF: predicated region fallthrough
CT: control target
= control target key end

     0   :  { %s2192_s15 = smov 0   ;;  %s2623_s0 = inlined_call_operand.vmem [shape: f32[2,32,256], index: 0, kind: input, shape index: {}]   ;;  %s2624_s1 = inlined_call_operand.vmem [shape: f32[12,32,32], index: 1, kind: input, shape index: {}]   ;;  %s2625_s2 = inlined_call_operand.vmem [shape: f32[9,32], index: 2, kind: input, shape index: {}]   ;;  %s2626_s3 = inlined_call_operand.vmem [shape: f32[2,32,1], index: 3, kind: input, shape index: {}]   ;;  %s2627_s4 = inlined_call_operand.vmem [shape: f32[2,32,256], index: 4, kind: output, shape index: {}]  }
   0x1 LB: > { %s1830_s16 = sadd.s32 4294967295, %s2161_s15   ;;  %p1834_p0 = scmp.ge.s32.totalorder %s2161_s15, 1  ;;  %s2161_s15 = sphi %s2192_s15, %s14_s15  }
   0x2   : > { %p162_p1 = scmp.lt.s32.totalorder %s2161_s15, 3 }
   0x4   : > { %p163_p2 = pnand %p1834_p0, %p162_p1 }
   0x5   : > { %p188_p3 = scmp.lt.s32.totalorder (!%p163_p2), %s1830_s16, 1 }
   0x6   : > { %166 = sbr.rel (%p163_p2) target bundleno = 3421 (0xd5d), region = 36 }
   0xb   : > { %v2203_v0 = vld [vmem:[%s2624_s1 + $0x18] sm:$0xff]  ;;  %v2163_v1 = vmov 1.0   ;;  %v2164_v2 = vmov 0.0   ;;  %v2209_v3 = vld [vmem:[%s2624_s1 + $0x10] sm:$0xff]  ;;  %s2629_s16 = smov (!%p188_p3, %s1830_s16), 1  ;;  %v2218_v4 = vld [vmem:[%s2624_s1 + $0x8] sm:$0xff] }
   0xc   : > { %270 = vmatprep.mubr.f32.mxu0 %v2163_v1  ;;  %1978 = vmatprep.subr.mxu1 %v2164_v2  ;;  %s1909_s23 = sshll.u32 %s2629_s16, 6  ;;  %v2258_v13 = vld [vmem:[%s2624_s1] sm:$0xff]  ;;  %vm2165_vm0 = vmmov 0   ;;  %vm338_vm1 = vcmask 261120   ;;  %v2271_v16 = vld [vmem:[%s2624_s1 + $0x38] sm:$0xff]  ;;  %v2278_v18 = vld [vmem:[%s2624_s1 + $0x30] sm:$0xff] }
   0xd   : > { %1979 = vmatpush3.msra.mxu1 %v2203_v0  ;;  %s192_s26 = scalar_lea.vmem %s2623_s0, %s1909_s23  ;;  %1986 = vmatprep.mubr.msk.f32.mxu1 %vm2165_vm0, %v2164_v2  ;;  %v2287_v19 = vld [vmem:[%s2624_s1 + $0x28] sm:$0xff]  ;;  %v2294_v20 = vld [vmem:[%s2624_s1 + $0x20] sm:$0xff]  ;;  %v2317_v26 = vld [vmem:[%s2624_s1 + $0x58] sm:$0xff]  ;;  %vm632_vm2 = vcmask 57344   ;;  %vm644_vm3 = vcmask 64512   ;;  %s197_s24 = scalar_lea.vmem %s2627_s4, %s1909_s23 }
   0xe   : > { %1980 = vmatprep.subr.mxu1 %v2164_v2  ;;  %v2228_v5 = vld [vmem:[%s192_s26 + $0x38] sm:$0xff]  ;;  %v2230_v6 = vld [vmem:[%s192_s26 + $0x30] sm:$0xff]  ;;  %v2232_v7 = vld [vmem:[%s192_s26 + $0x28] sm:$0xff] }
   0xf   : > { %1981 = vmatpush3.msra.mxu1 %v2209_v3  ;;  %230 = vmatprep.subr.mxu0 %v2228_v5  ;;  %v2239_v8 = vld [vmem:[%s192_s26 + $0x20] sm:$0xff]  ;;  %v2241_v9 = vld [vmem:[%s192_s26 + $0x18] sm:$0xff]  ;;  %v2245_v10 = vld [vmem:[%s192_s26 + $0x10] sm:$0xff] }
  0x10   : > { %1982 = vmatprep.subr.mxu1 %v2164_v2  ;;  %231 = vmatpush1.xpose.msra.mxu0 %v2230_v6  ;;  %v2247_v11 = vld [vmem:[%s192_s26 + $0x8] sm:$0xff]  ;;  %v2251_v12 = vld [vmem:[%s192_s26] sm:$0xff]  ;;  %v2322_v27 = vld [vmem:[%s2624_s1 + $0x50] sm:$0xff] }
  0x11   : > { %1983 = vmatpush3.msra.mxu1 %v2218_v4  ;;  %232 = vmatprep.subr.mxu0 %v2232_v7  ;;  %v2300_v21 = vld [vmem:[%s2625_s2] sm:$0xff]  ;;  %v2329_v28 = vld [vmem:[%s2624_s1 + $0x48] sm:$0xff]  ;;  %v1854_v41 = vld [vmem:[%s2624_s1 + $0x98] sm:$0xff] }
  0x12   : > { %1984 = vmatprep.subr.mxu1 %v2164_v2  ;;  %v2336_v29 = vld [vmem:[%s2624_s1 + $0x40] sm:$0xff]  ;;  %v1853_v42 = vld [vmem:[%s2624_s1 + $0x90] sm:$0xff]  ;;  %v1852_v43 = vld [vmem:[%s2624_s1 + $0x88] sm:$0xff] }
  0x13   : > { %1985 = vmatpush3.msra.mxu1 %v2258_v13  ;;  %v1850_v47 = vld [vmem:[%s2624_s1 + $0x78] sm:$0xff]  ;;  %v1849_v48 = vld [vmem:[%s2624_s1 + $0x70] sm:$0xff]  ;;  %v1848_v49 = vld [vmem:[%s2624_s1 + $0x68] sm:$0xff] }
  0x14   : > { %233 = vmatpush1.xpose.msra.mxu0 %v2239_v8  ;;  %1989 = vmatprep.subr.mxu1 %v2164_v2  ;;  %v1847_v50 = vld [vmem:[%s2624_s1 + $0x60] sm:$0xff]  ;;  %v1858_v56 = vld [vmem:[%s2624_s1 + $0xb8] sm:$0xff]  ;;  %v1857_v58 = vld [vmem:[%s2624_s1 + $0xb0] sm:$0xff] }
  0x15   : > { %234 = vmatprep.subr.mxu0 %v2241_v9  ;;  %v1851_v51 = vld [vmem:[%s2624_s1 + $0x80] sm:$0xff]  ;;  %v1862_v57 = vld [vmem:[%s2624_s1 + $0xd8] sm:$0xff]  ;;  %v1861_v59 = vld [vmem:[%s2624_s1 + $0xd0] sm:$0xff] }
  0x16   : > { %v1856_v60 = vld [vmem:[%s2624_s1 + $0xa8] sm:$0xff]  ;;  %v1855_v62 = vld [vmem:[%s2624_s1 + $0xa0] sm:$0xff] }
  0x17   : > { %v1860_v61 = vld [vmem:[%s2624_s1 + $0xc8] sm:$0xff]  ;;  %v1859_v63 = vld [vmem:[%s2624_s1 + $0xc0] sm:$0xff] }
  0x18   : > { %235 = vmatpush1.xpose.msra.mxu0 %v2245_v10 }
  0x19   : > { %236 = vmatprep.subr.mxu0 %v2247_v11 }
  0x1c   : > { %237 = vmatpush1.xpose.msra.mxu0 %v2251_v12 }
  0x1d   : > { %2000 = vmatprep.subr.mxu0 %v2164_v2 }
  0x1f   : > { %271 = vmatmul.mubr.f32.vlgmr.msra.gmra.mxu0 %v2163_v1  ;;  %v862_v1 = vlaneseq }
  0x20   : > { %2008 = vmatprep.mubr.msk.f32.mxu0 %vm2165_vm0, %v2164_v2  ;;  %2001 = vmatpush3.msra.mxu0 %v2317_v26 }
  0x21   : > { %2002 = vmatprep.subr.mxu0 %v2164_v2 }
  0x22   : > { %2003 = vmatpush3.msra.mxu0 %v2322_v27 }
  0x23   : > { %2004 = vmatprep.subr.mxu0 %v2164_v2 }
  0x24   : > { %2005 = vmatpush3.msra.mxu0 %v2329_v28 }
  0x25   : > { %2006 = vmatprep.subr.mxu0 %v2164_v2 }
  0x26   : > { %2007 = vmatpush3.msra.mxu0 %v2336_v29 }
  0x27   : > { %2009 = vmatmul.mubr.msk.f32.vlgmr.msra.gmra.mxu0 %vm338_vm1, %v2300_v21  ;;  %2021 = vmatprep.subr.mxu0 %v2164_v2 }
  0x28   : > { %2029 = vmatprep.mubr.msk.f32.mxu0 %vm2165_vm0, %v2164_v2  ;;  %2022 = vmatpush3.msra.mxu0 %v1854_v41 }
  0x29   : > { %2023 = vmatprep.subr.mxu0 %v2164_v2 }
  0x2a   : > { %2024 = vmatpush3.msra.mxu0 %v1853_v42 }
  0x2b   : > { %2025 = vmatprep.subr.mxu0 %v2164_v2 }
  0x2c   : > { %2026 = vmatpush3.msra.mxu0 %v1852_v43 }
  0x2d   : > { %2027 = vmatprep.subr.mxu0 %v2164_v2 }
  0x2e   : > { %2028 = vmatpush3.msra.mxu0 %v1851_v51 }
  0x2f   : > { %2043 = vmatprep.subr.mxu0 %v2164_v2 }
  0xdf   : > { %v272_v14 = vpop.f32.mrf.mxu0 }
  0xe0   : > { %v2266_v15 = vmul.f32 0.00390625, %v272_v14  ;;  %v2423_v14 = vshrl.u32 %v862_v1, 7  ;;  %v1868_v1 = vld [vmem:[%s2624_s1 + $0x108] sm:$0xff] }
  0xe1   : > { %v274_v17 = vpop.f32.mrf.mxu0 }
  0xe2   : > { %1987 = vmatmul.mubr.msk.f32.vlgmr.msra.gmra.mxu1 %vm338_vm1, %v2266_v15 }
  0xe3   : > { %1990 = vmatpush3.msra.mxu1 %v2271_v16  ;;  %1997 = vmatprep.mubr.msk.f32.mxu1 %vm2165_vm0, %v2164_v2 }
  0xe4   : > { %1991 = vmatprep.subr.mxu1 %v2164_v2 }
  0xe5   : > { %1992 = vmatpush3.msra.mxu1 %v2278_v18 }
  0xe6   : > { %1993 = vmatprep.subr.mxu1 %v2164_v2 }
  0xe7   : > { %1994 = vmatpush3.msra.mxu1 %v2287_v19  ;;  %v551_v39 = vpop.f32.mrf.mxu0 }
  0xe8   : > { %1995 = vmatprep.subr.mxu1 %v2164_v2 }
  0xe9   : > { %1996 = vmatpush3.msra.mxu1 %v2294_v20  ;;  %v2010_v40 = vpop.f32.mrf.mxu0 }
  0xea   : > { %1998 = vmatmul.mubr.msk.f32.vlgmr.msra.gmra.mxu1 %vm338_vm1, %v2300_v21  ;;  %2011 = vmatprep.subr.mxu1 %v2164_v2 }
  0xeb   : > { %2013 = vmatprep.mubr.msk.f32.mxu1 %vm2165_vm0, %v2164_v2 }
 0x1a2   : > { %v408_v22 = vpop.f32.mrf.mxu1 }
 0x1a4   : > { %v1988_v23 = vpop.f32.mrf.mxu1 }
 0x1a5   : > { %v864_v23 = vsub.s32 0, %v2423_v14  ;;  %v1880_v14 = vld [vmem:[%s2624_s1 + $0x168] sm:$0xff] }
 0x1aa   : > { %v481_v24 = vpop.f32.mrf.mxu1 }
 0x1ab   : > { %2012 = vmatpush3.xpose.msk.msra.mxu1 %vm338_vm1, %v481_v24 }
 0x1ac   : > { %v1999_v25 = vpop.f32.mrf.mxu1  ;;  %2016 = vmatprep.subr.mxu1 %v2164_v2 }
 0x1ae   : > { %2014 = vmatmul.mubr.msk.f32.vlgmr.msra.gmra.mxu1 %vm338_vm1, %v408_v22 }
 0x1af   : > { %2018 = vmatprep.mubr.msk.f32.mxu1 %vm2165_vm0, %v2164_v2  ;;  %2017 = vmatpush3.msra.mxu1 %v551_v39 }
 0x1b0   : > { %2032 = vmatprep.subr.mxu1 %v2164_v2 }
 0x26e   : > { %v627_v30 = vpop.f32.mrf.mxu1 }
 0x26f   : > { %v631_v31 = vmul.f32 0.17677669, %v627_v30 }
 0x270   : > { %v2015_v32 = vpop.f32.mrf.mxu1 }
 0x271   : > { %v633_v33 = vsel %vm632_vm2, %v631_v31, -inf  ;;  %v1866_v32 = vld [vmem:[%s2624_s1 + $0xf8] sm:$0xff] }
 0x272   : > { %634 = vmax.xlane.f32.xlu0 %v633_v33  ;;  %v1865_v33 = vld [vmem:[%s2624_s1 + $0xf0] sm:$0xff] }
 0x2fb   : > { %v635_v34 = vpop.xlane.xlu0 %634 }
 0x2fc   : > { %v636_v35 = vsub.f32 %v631_v31, %v635_v34  ;;  %v1863_v34 = vld [vmem:[%s2624_s1 + $0xe0] sm:$0xff] }
 0x2fe   : > { %v637_v36 = vmul.f32 1.442695, %v636_v35 }
 0x300   : > { %2143 = vpow2.f32 %v637_v36 }
 0x30d   : > { %v2144_v37 = vpop.eup %2143 }
 0x30e   : > { %v639_v38 = vsel %vm632_vm2, %v2144_v37, 0.0 }
 0x30f   : > { %640 = vadd.xlane.f32.xlu0 %v639_v38 }
 0x398   : > { %v641_v44 = vpop.xlane.xlu0 %640 }
 0x399   : > { %2145 = vrcp.f32 %v641_v44 }
 0x3a6   : > { %v2146_v45 = vpop.eup %2145 }
 0x3a7   : > { %v643_v46 = vmul.f32 %v2146_v45, %v2144_v37 }
 0x3a9   : > { %2019 = vmatmul.mubr.msk.f32.vlgmr.msra.gmra.mxu1 %vm644_vm3, %v643_v46 }
 0x3aa   : > { %2033 = vmatpush3.msra.mxu1 %v1850_v47  ;;  %2040 = vmatprep.mubr.msk.f32.mxu1 %vm2165_vm0, %v2164_v2 }
 0x3ab   : > { %2034 = vmatprep.subr.mxu1 %v2164_v2 }
 0x3ac   : > { %2035 = vmatpush3.msra.mxu1 %v1849_v48 }
 0x3ad   : > { %2036 = vmatprep.subr.mxu1 %v2164_v2 }
 0x3ae   : > { %2037 = vmatpush3.msra.mxu1 %v1848_v49 }
 0x3af   : > { %2038 = vmatprep.subr.mxu1 %v2164_v2 }
 0x3b0   : > { %2039 = vmatpush3.msra.mxu1 %v1847_v50  ;;  %v1867_v50 = vld [vmem:[%s2624_s1 + $0x100] sm:$0xff] }
 0x3b1   : > { %2041 = vmatmul.mubr.msk.f32.vlgmr.msra.gmra.mxu1 %vm338_vm1, %v2266_v15  ;;  %2054 = vmatprep.subr.mxu1 %v2164_v2  ;;  %v278_v15 = vld [vmem:[%s2625_s2 + $0x8] sm:$0x1] }
 0x3b2   : > { %2062 = vmatprep.mubr.msk.f32.mxu1 %vm2165_vm0, %v2164_v2  ;;  %2055 = vmatpush3.msra.mxu1 %v1862_v57  ;;  %v1875_v57 = vld [vmem:[%s2624_s1 + $0x140] sm:$0xff] }
 0x3b3   : > { %2056 = vmatprep.subr.mxu1 %v2164_v2 }
 0x3b4   : > { %2057 = vmatpush3.msra.mxu1 %v1861_v59 }
 0x3b5   : > { %2058 = vmatprep.subr.mxu1 %v2164_v2 }
 0x3b6   : > { %2059 = vmatpush3.msra.mxu1 %v1860_v61 }
 0x3b7   : > { %2060 = vmatprep.subr.mxu1 %v2164_v2 }
 0x3b8   : > { %2061 = vmatpush3.msra.mxu1 %v1859_v63 }
 0x3b9   : > { %2076 = vmatprep.subr.mxu1 %v2164_v2 }
 0x469   : > { %v714_v52 = vpop.f32.mrf.mxu1 }
 0x46a   : > { %2030 = vmatmul.mubr.msk.f32.vlgmr.msra.gmra.mxu0 %vm338_vm1, %v714_v52 }
 0x46b   : > { %v2020_v53 = vpop.f32.mrf.mxu1  ;;  %2051 = vmatprep.mubr.msk.f32.mxu0 %vm2165_vm0, %v2164_v2  ;;  %2044 = vmatpush3.msra.mxu0 %v1858_v56 }
 0x46c   : > { %2045 = vmatprep.subr.mxu0 %v2164_v2 }
 0x46d   : > { %2046 = vmatpush3.msra.mxu0 %v1857_v58 }
 0x46e   : > { %2047 = vmatprep.subr.mxu0 %v2164_v2 }
 0x46f   : > { %2048 = vmatpush3.msra.mxu0 %v1856_v60 }
 0x470   : > { %2049 = vmatprep.subr.mxu0 %v2164_v2 }
 0x471   : > { %v857_v54 = vpop.f32.mrf.mxu1  ;;  %2050 = vmatpush3.msra.mxu0 %v1855_v62 }
 0x472   : > { %2065 = vmatprep.subr.mxu0 %v2164_v2 }
 0x473   : > { %v2042_v55 = vpop.f32.mrf.mxu1 }
 0x474   : > { %v1869_v55 = vld [vmem:[%s2624_s1 + $0x110] sm:$0xff] }
 0x52a   : > { %v787_v17 = vpop.f32.mrf.mxu0 }
 0x52b   : > { %v858_v22 = vadd.f32 %v857_v54, %v787_v17 }
 0x52c   : > { %v2031_v24 = vpop.f32.mrf.mxu0 }
 0x52d   : > { %v861_v25 = vadd.f32 %v858_v22, %v278_v15  ;;  %v1870_v24 = vld [vmem:[%s2624_s1 + $0x118] sm:$0xff] }
 0x52f   : > { %v2431_v30 = vrot.slane %v861_v25, %v864_v23 }
 0x531   : > { %v866_v31 = vadd.f32 %v2431_v30, %v2300_v21  ;;  %v1864_v21 = vld [vmem:[%s2624_s1 + $0xe8] sm:$0xff]  ;;  %v1638_v54 = vmul.f32 %v1867_v50, %v2431_v30  ;;  %v1682_v59 = vmul.f32 %v1875_v57, %v2431_v30  ;;  %v1639_v22 = vmul.f32 %v1868_v1, %v2431_v30  ;;  %v1877_v50 = vld [vmem:[%s2624_s1 + $0x150] sm:$0xff]  ;;  %v1658_v1 = vld [vmem:[%s2626_s3] sm:$0xff] }
 0x533   : > { %2052 = vmatmul.mubr.msk.f32.vlgmr.msra.gmra.mxu0 %vm338_vm1, %v866_v31  ;;  %2063 = vmatmul.mubr.msk.f32.vlgmr.msra.gmra.mxu1 %vm338_vm1, %v866_v31  ;;  %v1642_v56 = vsel %vm338_vm1, %v1638_v54, 0.0  ;;  %v1686_v60 = vsel %vm338_vm1, %v1682_v59, 0.0  ;;  %v1684_v54 = vmul.f32 %v1877_v50, %v2431_v30 }
 0x534   : > { %2066 = vmatpush3.msra.mxu0 %v1866_v32  ;;  %2073 = vmatprep.mubr.msk.f32.mxu0 %vm2165_vm0, %v2164_v2  ;;  %v1876_v32 = vld [vmem:[%s2624_s1 + $0x148] sm:$0xff] }
 0x535   : > { %2067 = vmatprep.subr.mxu0 %v2164_v2  ;;  %2078 = vmatprep.mubr.msk.f32.mxu1 %vm2165_vm0, %v2164_v2 }
 0x536   : > { %2068 = vmatpush3.msra.mxu0 %v1865_v33 }
 0x537   : > { %2069 = vmatprep.subr.mxu0 %v2164_v2 }
 0x538   : > { %2070 = vmatpush3.msra.mxu0 %v1864_v21  ;;  %v1683_v21 = vmul.f32 %v1876_v32, %v2431_v30  ;;  %v1660_v32 = vld [vmem:[%s2626_s3 + $0x10] sm:$0xff] }
 0x539   : > { %2071 = vmatprep.subr.mxu0 %v2164_v2 }
 0x53a   : > { %2072 = vmatpush3.msra.mxu0 %v1863_v34  ;;  %v1690_v34 = vsel %vm338_vm1, %v1683_v21, 0.0 }
 0x53b   : > { %2074 = vmatmul.mubr.msk.f32.vlgmr.msra.gmra.mxu0 %vm338_vm1, %v866_v31  ;;  %2086 = vmatprep.subr.mxu0 %v2164_v2  ;;  %v1641_v31 = vmul.f32 %v1870_v24, %v2431_v30 }
 0x53c   : > { %2087 = vmatpush3.msra.mxu0 %v2203_v0  ;;  %2094 = vmatprep.mubr.msk.f32.mxu0 %vm2165_vm0, %v2164_v2 }
 0x53d   : > { %2088 = vmatprep.subr.mxu0 %v2164_v2  ;;  %v1654_v33 = vsel %vm338_vm1, %v1641_v31, 0.0 }
 0x53e   : > { %2089 = vmatpush3.msra.mxu0 %v2209_v3 }
 0x53f   : > { %2090 = vmatprep.subr.mxu0 %v2164_v2 }
 0x540   : > { %2091 = vmatpush3.msra.mxu0 %v2218_v4 }
 0x541   : > { %2092 = vmatprep.subr.mxu0 %v2164_v2 }
 0x542   : > { %2093 = vmatpush3.msra.mxu0 %v2258_v13 }
 0x543   : > { %2095 = vmatmul.mubr.msk.f32.vlgmr.msra.gmra.mxu0 %vm338_vm1, %v861_v25  ;;  %2108 = vmatprep.subr.mxu0 %v2164_v2  ;;  %v1646_v25 = vsel %vm338_vm1, %v1639_v22, 0.0 }
 0x544   : > { %2109 = vmatpush3.msra.mxu0 %v2317_v26  ;;  %2116 = vmatprep.mubr.msk.f32.mxu0 %vm2165_vm0, %v2164_v2 }
 0x545   : > { %2110 = vmatprep.subr.mxu0 %v2164_v2 }
 0x546   : > { %2111 = vmatpush3.msra.mxu0 %v2322_v27 }
 0x547   : > { %2112 = vmatprep.subr.mxu0 %v2164_v2 }
 0x548   : > { %2113 = vmatpush3.msra.mxu0 %v2329_v28 }
 0x549   : > { %2114 = vmatprep.subr.mxu0 %v2164_v2 }
 0x54a   : > { %2115 = vmatpush3.msra.mxu0 %v2336_v29 }
 0x5f3   : > { %v936_v0 = vpop.f32.mrf.mxu0  ;;  %v1006_v3 = vpop.f32.mrf.mxu1 }
 0x5f4   : > { %2077 = vmatpush3.xpose.msk.msra.mxu1 %vm338_vm1, %v1006_v3 }
 0x5f5   : > { %v2053_v4 = vpop.f32.mrf.mxu0  ;;  %v2064_v13 = vpop.f32.mrf.mxu1  ;;  %2081 = vmatprep.subr.mxu1 %v2164_v2 }
 0x5f7   : > { %2079 = vmatmul.mubr.msk.f32.vlgmr.msra.gmra.mxu1 %vm338_vm1, %v936_v0 }
 0x5f8   : > { %2083 = vmatprep.mubr.msk.f32.mxu1 %vm2165_vm0, %v2164_v2 }
 0x5fb   : > { %v1076_v26 = vpop.f32.mrf.mxu0 }
 0x5fc   : > { %2082 = vmatpush3.msra.mxu1 %v1076_v26  ;;  %v1872_v26 = vld [vmem:[%s2624_s1 + $0x128] sm:$0xff] }
 0x5fd   : > { %v2075_v27 = vpop.f32.mrf.mxu0  ;;  %2097 = vmatprep.subr.mxu1 %v2164_v2 }
 0x5fe   : > { %v1871_v27 = vld [vmem:[%s2624_s1 + $0x120] sm:$0xff] }
 0x603   : > { %v1310_v28 = vpop.f32.mrf.mxu0 }
 0x605   : > { %v2096_v29 = vpop.f32.mrf.mxu0 }
 0x6b7   : > { %v1152_v35 = vpop.f32.mrf.mxu1 }
 0x6b8   : > { %v1156_v36 = vmul.f32 0.17677669, %v1152_v35  ;;  %v1874_v35 = vld [vmem:[%s2624_s1 + $0x138] sm:$0xff] }
 0x6b9   : > { %v2080_v37 = vpop.f32.mrf.mxu1 }
 0x6ba   : > { %v1157_v38 = vsel %vm644_vm3, %v1156_v36, -inf }
 0x6bb   : > { %1158 = vmax.xlane.f32.xlu1 %v1157_v38 }
 0x744   : > { %v1159_v39 = vpop.xlane.xlu1 %1158 }
 0x745   : > { %v1160_v40 = vsub.f32 %v1156_v36, %v1159_v39  ;;  %v1873_v36 = vld [vmem:[%s2624_s1 + $0x130] sm:$0xff] }
 0x747   : > { %v1161_v41 = vmul.f32 1.442695, %v1160_v40 }
 0x749   : > { %2147 = vpow2.f32 %v1161_v41 }
 0x756   : > { %v2148_v42 = vpop.eup %2147 }
 0x757   : > { %v1163_v43 = vsel %vm644_vm3, %v2148_v42, 0.0 }
 0x758   : > { %1164 = vadd.xlane.f32.xlu1 %v1163_v43 }
 0x7e1   : > { %v1165_v44 = vpop.xlane.xlu1 %1164 }
 0x7e2   : > { %2149 = vrcp.f32 %v1165_v44 }
 0x7ef   : > { %v2150_v45 = vpop.eup %2149 }
 0x7f0   : > { %v1167_v46 = vmul.f32 %v2150_v45, %v2148_v42 }
 0x7f2   : > { %2084 = vmatmul.mubr.msk.f32.vlgmr.msra.gmra.mxu1 %vm644_vm3, %v1167_v46 }
 0x7f3   : > { %2098 = vmatpush3.msra.mxu1 %v2271_v16  ;;  %2105 = vmatprep.mubr.msk.f32.mxu1 %vm2165_vm0, %v2164_v2 }
 0x7f4   : > { %2099 = vmatprep.subr.mxu1 %v2164_v2 }
 0x7f5   : > { %2100 = vmatpush3.msra.mxu1 %v2278_v18 }
 0x7f6   : > { %2101 = vmatprep.subr.mxu1 %v2164_v2 }
 0x7f7   : > { %2102 = vmatpush3.msra.mxu1 %v2287_v19 }
 0x7f8   : > { %2103 = vmatprep.subr.mxu1 %v2164_v2 }
 0x7f9   : > { %2104 = vmatpush3.msra.mxu1 %v2294_v20 }
 0x7fa   : > { %2119 = vmatprep.subr.mxu1 %v2164_v2 }
 0x8b2   : > { %v1237_v47 = vpop.f32.mrf.mxu1 }
 0x8b3   : > { %2106 = vmatmul.mubr.msk.f32.vlgmr.msra.gmra.mxu1 %vm338_vm1, %v1237_v47  ;;  %2117 = vmatmul.mubr.msk.f32.vlgmr.msra.gmra.mxu0 %vm338_vm1, %v1237_v47  ;;  %v1882_v47 = vld [vmem:[%s2624_s1 + $0x178] sm:$0xff] }
 0x8b4   : > { %v2085_v16 = vpop.f32.mrf.mxu1  ;;  %2121 = vmatprep.mubr.msk.f32.mxu1 %vm2165_vm0, %v2164_v2 }
 0x8b5   : > { %v1881_v16 = vld [vmem:[%s2624_s1 + $0x170] sm:$0xff] }
 0x973   : > { %v1383_v18 = vpop.f32.mrf.mxu1  ;;  %v1453_v48 = vpop.f32.mrf.mxu0 }
 0x974   : > { %2120 = vmatpush3.xpose.msk.msra.mxu1 %vm338_vm1, %v1383_v18 }
 0x975   : > { %v2107_v19 = vpop.f32.mrf.mxu1  ;;  %v2118_v49 = vpop.f32.mrf.mxu0  ;;  %2124 = vmatprep.subr.mxu1 %v2164_v2 }
 0x977   : > { %2122 = vmatmul.mubr.msk.f32.vlgmr.msra.gmra.mxu1 %vm338_vm1, %v1310_v28 }
 0x978   : > { %2125 = vmatpush3.msra.mxu1 %v1453_v48  ;;  %2126 = vmatprep.mubr.msk.f32.mxu1 %vm2165_vm0, %v2164_v2  ;;  %v1640_v2 = vmul.f32 %v1869_v55, %v2431_v30  ;;  %v2166_v55 = vmov 0  }
 0x979   : > { %2142 = vset.pattern.permute.xlu1 %v2166_v55  ;;  %2141 = vset.pattern.permute.xlu0 %v2166_v55 }
 0x97a   : > { %v1650_v58 = vsel %vm338_vm1, %v1640_v2, 0.0  ;;  %v1694_v2 = vsel %vm338_vm1, %v1684_v54, 0.0 }
 0xa37   : > { %v1529_v20 = vpop.f32.mrf.mxu1 }
 0xa38   : > { %v1533_v51 = vmul.f32 0.17677669, %v1529_v20  ;;  %v1878_v20 = vld [vmem:[%s2624_s1 + $0x158] sm:$0xff] }
 0xa39   : > { %v2123_v52 = vpop.f32.mrf.mxu1 }
 0xa3a   : > { %v1534_v53 = vsel %vm632_vm2, %v1533_v51, -inf }
 0xa3b   : > { %1535 = vmax.xlane.f32.xlu0 %v1534_v53  ;;  %v1685_v53 = vmul.f32 %v1878_v20, %v2431_v30  ;;  %v1659_v30 = vld [vmem:[%s2626_s3 + $0x8] sm:$0xff] }
 0xa3f   : > { %1643 = vadd.xlane.f32.xlu0 %v1642_v56  ;;  %v1698_v56 = vsel %vm338_vm1, %v1685_v53, 0.0 }
 0xa43   : > { %1651 = vadd.xlane.f32.xlu0 %v1650_v58 }
 0xa47   : > { %1687 = vadd.xlane.f32.xlu0 %v1686_v60 }
 0xac4   : > { %v1536_v61 = vpop.xlane.xlu0 %1535 }
 0xac5   : > { %v1537_v62 = vsub.f32 %v1533_v51, %v1536_v61 }
 0xac7   : > { %v1538_v63 = vmul.f32 1.442695, %v1537_v62 }
 0xac8   : > { %v1644_v57 = vpop.xlane.xlu0 %1643 }
 0xac9   : > { %2151 = vpow2.f32 %v1538_v63 }
 0xacc   : > { %v1652_v59 = vpop.xlane.xlu0 %1651 }
 0xad0   : > { %v1688_v61 = vpop.xlane.xlu0 %1687 }
 0xad6   : > { %v2152_v15 = vpop.eup %2151 }
 0xad7   : > { %v1540_v17 = vsel %vm632_vm2, %v2152_v15, 0.0 }
 0xad8   : > { %1541 = vadd.xlane.f32.xlu1 %v1540_v17 }
 0xadc   : > { %1647 = vadd.xlane.f32.xlu1 %v1646_v25 }
 0xae0   : > { %1655 = vadd.xlane.f32.xlu1 %v1654_v33 }
 0xae4   : > { %1691 = vadd.xlane.f32.xlu1 %v1690_v34 }
 0xb61   : > { %v1542_v0 = vpop.xlane.xlu1 %1541 }
 0xb62   : > { %2153 = vrcp.f32 %v1542_v0 }
 0xb65   : > { %v1648_v58 = vpop.xlane.xlu1 %1647 }
 0xb69   : > { %v1656_v60 = vpop.xlane.xlu1 %1655 }
 0xb6d   : > { %v1692_v62 = vpop.xlane.xlu1 %1691 }
 0xb6f   : > { %v2154_v3 = vpop.eup %2153 }
 0xb70   : > { %v1544_v4 = vmul.f32 %v2154_v3, %v2152_v15  ;;  %v1661_v3 = vld [vmem:[%s2626_s3 + $0x18] sm:$0xff] }
 0xb72   : > { %2127 = vmatmul.mubr.msk.f32.vlgmr.msra.gmra.mxu1 %vm644_vm3, %v1544_v4 }
 0xc32   : > { %v1614_v13 = vpop.f32.mrf.mxu1 }
 0xc33   : > { %v1621_v28 = vrot.slane %v1614_v13, %v864_v23  ;;  %v1879_v23 = vld [vmem:[%s2624_s1 + $0x160] sm:$0xff] }
 0xc34   : > { %v2128_v29 = vpop.f32.mrf.mxu1 }
 0xc35   : > { %v1623_v37 = vmul.f32 %v1872_v26, %v1621_v28  ;;  %v1622_v38 = vmul.f32 %v1871_v27, %v1621_v28  ;;  %v1625_v41 = vmul.f32 %v1874_v35, %v1621_v28  ;;  %v1624_v42 = vmul.f32 %v1873_v36, %v1621_v28 }
 0xc36   : > { %v1667_v45 = vmul.f32 %v1880_v14, %v1621_v28  ;;  %v1666_v46 = vmul.f32 %v1879_v23, %v1621_v28  ;;  %v1669_v19 = vmul.f32 %v1882_v47, %v1621_v28  ;;  %v1668_v49 = vmul.f32 %v1881_v16, %v1621_v28  ;;  %v1903_v28 = vld [vmem:[%s2626_s3 + $0x20] sm:$0xff]  ;;  %v1905_v14 = vld [vmem:[%s2626_s3 + $0x30] sm:$0xff] }
 0xc37   : > { %v1629_v39 = vsel %vm338_vm1, %v1623_v37, 0.0  ;;  %v1626_v40 = vsel %vm338_vm1, %v1622_v38, 0.0  ;;  %v1635_v43 = vsel %vm338_vm1, %v1625_v41, 0.0  ;;  %v1632_v44 = vsel %vm338_vm1, %v1624_v42, 0.0  ;;  %v1904_v38 = vld [vmem:[%s2626_s3 + $0x28] sm:$0xff] }
 0xc38   : > { %1630 = vadd.xlane.f32.xlu1 %v1629_v39  ;;  %1627 = vadd.xlane.f32.xlu0 %v1626_v40  ;;  %v1673_v18 = vsel %vm338_vm1, %v1667_v45, 0.0  ;;  %v1670_v48 = vsel %vm338_vm1, %v1666_v46, 0.0  ;;  %v1679_v51 = vsel %vm338_vm1, %v1669_v19, 0.0  ;;  %v1676_v52 = vsel %vm338_vm1, %v1668_v49, 0.0 }
 0xc3c   : > { %1636 = vadd.xlane.f32.xlu1 %v1635_v43  ;;  %1633 = vadd.xlane.f32.xlu0 %v1632_v44  ;;  %v1906_v44 = vld [vmem:[%s2626_s3 + $0x38] sm:$0xff] }
 0xc40   : > { %1674 = vadd.xlane.f32.xlu1 %v1673_v18  ;;  %1671 = vadd.xlane.f32.xlu0 %v1670_v48 }
 0xc44   : > { %1680 = vadd.xlane.f32.xlu1 %v1679_v51  ;;  %1677 = vadd.xlane.f32.xlu0 %v1676_v52 }
 0xc48   : > { %1699 = vadd.xlane.f32.xlu1 %v1698_v56  ;;  %1695 = vadd.xlane.f32.xlu0 %v1694_v2 }
 0xcc1   : > { %v1631_v63 = vpop.xlane.xlu1 %1630  ;;  %v1628_v15 = vpop.xlane.xlu0 %1627 }
 0xcc2   : > { %v1649_v17 = vadd.f32 %v1648_v58, %v1631_v63  ;;  %v1645_v22 = vadd.f32 %v1644_v57, %v1628_v15 }
 0xcc4   : > { %v1663_v24 = vadd.f32 %v1659_v30, %v1649_v17  ;;  %v1662_v25 = vadd.f32 %v1658_v1, %v1645_v22 }
 0xcc5   : > { %v1637_v31 = vpop.xlane.xlu1 %1636  ;;  %v1634_v33 = vpop.xlane.xlu0 %1633 }
 0xcc6   : > { %v1653_v21 = vadd.f32 %v1652_v59, %v1634_v33  ;;  %1718 = vperm.xlu1 %2142, %v1663_v24   ;;  %1713 = vperm.xlu0 %2141, %v1662_v25   ;;  %v1657_v34 = vadd.f32 %v1656_v60, %v1637_v31 }
 0xcc8   : > { %v1664_v0 = vadd.f32 %v1660_v32, %v1653_v21  ;;  %v1665_v26 = vadd.f32 %v1661_v3, %v1657_v34 }
 0xcc9   : > { %v1675_v4 = vpop.xlane.xlu1 %1674  ;;  %v1672_v13 = vpop.xlane.xlu0 %1671 }
 0xcca   : > { %1723 = vperm.xlu1 %2142, %v1664_v0   ;;  %v1689_v27 = vadd.f32 %v1688_v61, %v1672_v13  ;;  %v1693_v36 = vadd.f32 %v1692_v62, %v1675_v4 }
 0xccc   : > { %v1707_v37 = vadd.f32 %v1903_v28, %v1689_v27  ;;  %v1708_v40 = vadd.f32 %v1904_v38, %v1693_v36 }
 0xccd   : > { %v1678_v29 = vpop.xlane.xlu0 %1677  ;;  %v1681_v35 = vpop.xlane.xlu1 %1680 }
 0xcce   : > { %1728 = vperm.xlu1 %2142, %v1665_v26  }
 0xcd1   : > { %v1696_v39 = vpop.xlane.xlu0 %1695  ;;  %v1700_v42 = vpop.xlane.xlu1 %1699 }
 0xcd2   : > { %1741 = vperm.xlu1 %2142, %v1707_v37   ;;  %v1697_v41 = vadd.f32 %v1696_v39, %v1678_v29  ;;  %v1701_v23 = vadd.f32 %v1700_v42, %v1681_v35 }
 0xcd4   : > { %v1709_v43 = vadd.f32 %v1905_v14, %v1697_v41  ;;  %v1710_v45 = vadd.f32 %v1906_v44, %v1701_v23 }
 0xcd6   : > { %1746 = vperm.xlu1 %2142, %v1708_v40  }
 0xcda   : > { %1751 = vperm.xlu1 %2142, %v1709_v43  }
 0xcde   : > { %1756 = vperm.xlu1 %2142, %v1710_v45  }
 0xd41   : > { %v1719_v46 = vpop.permute.xlu1 %1718  ;;  %v1714_v16 = vpop.permute.xlu0 %1713 }
 0xd42   : > { %v1731_v48 = vmul.f32 %v1714_v16, %v2251_v12  ;;  %v1732_v19 = vmul.f32 %v1714_v16, %v2247_v11  ;;  %v1733_v51 = vmul.f32 %v1719_v46, %v2245_v10  ;;  %v1734_v52 = vmul.f32 %v1719_v46, %v2241_v9 }
 0xd45   : > { %v1724_v47 = vpop.permute.xlu1 %1723 }
 0xd46   : > { %v1735_v12 = vmul.f32 %v1724_v47, %v2239_v8  ;;  %v1736_v11 = vmul.f32 %v1724_v47, %v2232_v7 }
 0xd49   : > { %v1729_v18 = vpop.permute.xlu1 %1728 }
 0xd4a   : > { %v1737_v58 = vmul.f32 %v1729_v18, %v2230_v6  ;;  %v1738_v10 = vmul.f32 %v1729_v18, %v2228_v5 }
 0xd4d   : > { %v1742_v49 = vpop.permute.xlu1 %1741 }
 0xd4e   : > { %v1759_v20 = vadd.f32 %v1742_v49, %v1731_v48  ;;  %v1760_v50 = vadd.f32 %v1742_v49, %v1732_v19 }
 0xd50   : > { %1767 = vst [vmem:[%s197_s24] sm:$0xff] %v1759_v20  ;;  %1768 = vst [vmem:[%s197_s24 + $0x8] sm:$0xff] %v1760_v50 }
 0xd51   : > { %v1747_v53 = vpop.permute.xlu1 %1746 }
 0xd52   : > { %v1761_v54 = vadd.f32 %v1747_v53, %v1733_v51  ;;  %v1762_v55 = vadd.f32 %v1747_v53, %v1734_v52 }
 0xd54   : > { %1769 = vst [vmem:[%s197_s24 + $0x10] sm:$0xff] %v1761_v54  ;;  %1770 = vst [vmem:[%s197_s24 + $0x18] sm:$0xff] %v1762_v55 }
 0xd55   : > { %v1752_v56 = vpop.permute.xlu1 %1751 }
 0xd56   : > { %v1763_v2 = vadd.f32 %v1752_v56, %v1735_v12  ;;  %v1764_v57 = vadd.f32 %v1752_v56, %v1736_v11 }
 0xd58   : > { %1771 = vst [vmem:[%s197_s24 + $0x20] sm:$0xff] %v1763_v2  ;;  %1772 = vst [vmem:[%s197_s24 + $0x28] sm:$0xff] %v1764_v57 }
 0xd59   : > { %v1757_v9 = vpop.permute.xlu1 %1756 }
 0xd5a   : > { %v1765_v59 = vadd.f32 %v1757_v9, %v1737_v58  ;;  %v1766_v60 = vadd.f32 %v1757_v9, %v1738_v10 }
 0xd5c   : > { %1773 = vst [vmem:[%s197_s24 + $0x30] sm:$0xff] %v1765_v59  ;;  %1774 = vst [vmem:[%s197_s24 + $0x38] sm:$0xff] %v1766_v60 }
 0xd5d PF: > { %s14_s15 = sadd.s32 1, %s2161_s15  }
 0xd5e   : > { %p11_p4 = scmp.ge.s32.totalorder %s14_s15, 4  }
 0xd60   :  { %13 = sbr.rel (!%p11_p4) target bundleno = 1 (0x1), region = 78 }

</bundles_post_ra>
